<compile_context>
chip_gen: v6e
topology: v6e:2x2x1
jax: 0.10.0
libtpu: 0.0.40
codegen_flags: <defaults>
</compile_context>

<pallas_src>
import functools

import jax
import jax.numpy as jnp
from jax import lax
from jax.experimental import pallas as pl
from jax.experimental.pallas import tpu as pltpu

_EPS_NORMALIZE = 1e-12   # F.normalize default eps
_EPS_COSSIM = 1e-8       # nn.CosineSimilarity default eps (see eps note above)
_NUM_CORES = 2           # megacore split; harmless (sequential) on 1-TC chips


def _contrastive_kernel(fea_ref, pos_ref, neg_ref, out_ref, *,
                        tao, batch, tile_rows, blocks_per_core, needs_mask):
    c = pl.program_id(0)     # core / outer-parallel index
    i = pl.program_id(1)     # reduction block index within this core

    @pl.when(i == 0)
    def _init():
        out_ref[...] = jnp.zeros_like(out_ref)

    fea = fea_ref[...].astype(jnp.float32)   # (TB, D)
    pos = pos_ref[...].astype(jnp.float32)
    neg = neg_ref[...].astype(jnp.float32)

    # Row reductions: 3 squared norms + 2 dots (no full-tile normalize divides).
    ff = jnp.sum(fea * fea, axis=-1, keepdims=True)   # (TB, 1)
    pp = jnp.sum(pos * pos, axis=-1, keepdims=True)
    nn_ = jnp.sum(neg * neg, axis=-1, keepdims=True)
    fp = jnp.sum(fea * pos, axis=-1, keepdims=True)
    fn = jnp.sum(fea * neg, axis=-1, keepdims=True)

    eps2 = jnp.float32(_EPS_NORMALIZE * _EPS_NORMALIZE)
    inv_f = lax.rsqrt(jnp.maximum(ff, eps2))          # EUP, not VALU
    inv_p = lax.rsqrt(jnp.maximum(pp, eps2))
    inv_n = lax.rsqrt(jnp.maximum(nn_, eps2))

    pos_sim = fp * inv_f * inv_p                      # (TB, 1)
    neg_sim = fn * inv_f * inv_n

    # -log(ep / (ep + en)) == softplus((neg - pos) / tao), numerically stable:
    z = (neg_sim - pos_sim) * jnp.float32(1.0 / tao)
    loss = jnp.maximum(z, 0.0) + jnp.log1p(jnp.exp(-jnp.abs(z)))   # (TB, 1)

    if needs_mask:
        # Discard rows of partial / phantom blocks beyond the batch.  Keep the
        # select (not a multiplicative mask) so garbage/NaN rows cannot leak.
        blk = c * blocks_per_core + i
        row_ids = blk * tile_rows + lax.broadcasted_iota(jnp.int32, loss.shape, 0)
        loss = jnp.where(row_ids < batch, loss, 0.0)

    out_ref[...] += jnp.sum(loss)


def _vmem_limit_bytes():
    """Generation-aware scoped-VMEM request (v7x has 64 MiB, v5e/v6e 128 MiB)."""
    try:
        phys = int(pltpu.get_tpu_info().vmem_capacity_bytes)
    except Exception:
        phys = 64 * 1024 * 1024   # conservative fallback (v7x per-TC)
    return min(phys * 3 // 4, 64 * 1024 * 1024)


def _pick_tile_rows(B, D, itemsize, vmem_limit, block_rows=None):
    """Rows per block, targeting ~4 MiB per input pipeline buffer.

    3 inputs x 2 pipeline buffers -> <= ~24 MiB of input VMEM, which leaves >=2x
    headroom inside the requested scoped-VMEM limit on every generation.
    """
    sublane = {4: 8, 2: 16, 1: 32}.get(itemsize, 8)
    if block_rows is not None:                       # test/tuning override
        tb = max(sublane, (int(block_rows) // sublane) * sublane)
        return B if tb >= B else tb
    per_buffer = min(4 * 1024 * 1024, vmem_limit // 8)
    max_rows = max(sublane, per_buffer // (D * itemsize))
    if max_rows >= B:
        return B                                     # full-extent block: always legal
    return max(sublane, (max_rows // sublane) * sublane)


def contrastive_loss(fea, pos_fea, neg_fea, tao=0.5, block_rows=None):
    """Pallas implementation of Contrastive_loss.forward.

    fea, pos_fea, neg_fea: (B, D) arrays (f32 or bf16). Returns scalar f32 loss.
    """
    B, D = fea.shape
    itemsize = jnp.dtype(fea.dtype).itemsize
    vmem_limit = _vmem_limit_bytes()
    tb = _pick_tile_rows(B, D, itemsize, vmem_limit, block_rows)

    nb_total = pl.cdiv(B, tb)                 # real batch blocks
    nbpc = pl.cdiv(nb_total, _NUM_CORES)      # blocks per core (may include phantoms)
    grid = (_NUM_CORES, nbpc)
    needs_mask = (_NUM_CORES * nbpc * tb) != B

    kernel = functools.partial(
        _contrastive_kernel,
        tao=float(tao), batch=B, tile_rows=tb,
        blocks_per_core=nbpc, needs_mask=needs_mask)

    def in_map(c, i):
        # Clamp phantom blocks (core 1's tail when nb_total is odd / small) onto
        # the last real block; their rows are discarded by the in-kernel mask.
        return (jnp.minimum(c * nbpc + i, nb_total - 1), 0)

    in_spec = pl.BlockSpec((tb, D), in_map)

    partials = pl.pallas_call(
        kernel,
        out_shape=jax.ShapeDtypeStruct((_NUM_CORES, 1, 1), jnp.float32),
        grid=grid,
        in_specs=[in_spec, in_spec, in_spec],
        out_specs=pl.BlockSpec((1, 1, 1), lambda c, i: (c, 0, 0)),
        compiler_params=pltpu.CompilerParams(
            dimension_semantics=("parallel", "arbitrary"),
            vmem_limit_bytes=vmem_limit),
    )(fea, pos_fea, neg_fea)

    # Final mean over the per-core partial sums (tiny, done in plain JAX).
    return jnp.sum(partials) * jnp.float32(1.0 / B)


def _reference(fea, pos_fea, neg_fea, tao=0.5):
    # Pure-JAX reference mirroring the PyTorch code.
    def l2n(x):
        n = jnp.linalg.norm(x, axis=1, keepdims=True)
        return x / jnp.maximum(n, _EPS_NORMALIZE)

    def cs(a, b):
        dot = jnp.sum(a * b, axis=-1)
        return dot / jnp.maximum(
            jnp.linalg.norm(a, axis=-1) * jnp.linalg.norm(b, axis=-1), _EPS_COSSIM)

    f, p, n = l2n(fea), l2n(pos_fea), l2n(neg_fea)
    ps, ns = cs(f, p), cs(f, n)
    logits = jnp.exp(ps / tao) / (jnp.exp(ps / tao) + jnp.exp(ns / tao))
    return jnp.mean(-jnp.log(logits))


if __name__ == "__main__":
    key = jax.random.PRNGKey(0)
    k1, k2, k3 = jax.random.split(key, 3)

    # Test 1: small, even shape.
    B, D = 8, 32
    fea = jax.random.normal(k1, (B, D), dtype=jnp.float32)
    pos_fea = jax.random.normal(k2, (B, D), dtype=jnp.float32)
    neg_fea = jax.random.normal(k3, (B, D), dtype=jnp.float32)
    loss = contrastive_loss(fea, pos_fea, neg_fea, tao=0.5)
    jax.block_until_ready(loss)
    ref = _reference(fea, pos_fea, neg_fea, tao=0.5)
    assert jnp.allclose(loss, ref, atol=1e-5, rtol=1e-5), (loss, ref)

    # Test 2: odd batch + forced small block to exercise multi-block grid,
    # partial-block masking, phantom blocks and the 2-core split.
    B2, D2 = 50, 128
    k4, k5, k6 = jax.random.split(jax.random.PRNGKey(0), 3)
    fea2 = jax.random.normal(k4, (B2, D2), dtype=jnp.float32)
    pos2 = jax.random.normal(k5, (B2, D2), dtype=jnp.float32)
    neg2 = jax.random.normal(k6, (B2, D2), dtype=jnp.float32)
    loss2 = contrastive_loss(fea2, pos2, neg2, tao=0.07, block_rows=8)
    jax.block_until_ready(loss2)
    ref2 = _reference(fea2, pos2, neg2, tao=0.07)
    assert jnp.allclose(loss2, ref2, atol=1e-5, rtol=1e-5), (loss2, ref2)

    print("KERNEL_OK")
</pallas_src>

<mosaic_0001>
module attributes {stable_mosaic.version = 11 : i64} {
  func.func @_contrastive_kernel(%arg0: i32, %arg1: i32, %arg2: memref<8x32xf32, #tpu.memory_space<vmem>>, %arg3: memref<8x32xf32, #tpu.memory_space<vmem>>, %arg4: memref<8x32xf32, #tpu.memory_space<vmem>>, %arg5: memref<1x1x1xf32, #tpu.memory_space<vmem>>) attributes {dimension_semantics = [#tpu.dimension_semantics<parallel>, #tpu.dimension_semantics<arbitrary>], iteration_bounds = array<i64: 2, 1>, scalar_prefetch = 0 : i64, scratch_operands = 0 : i64, tpu.core_type = #tpu.core_type<tc>, window_params = [{transform_indices = @transform_0, window_bounds = array<i64: 8, 32>}, {transform_indices = @transform_1, window_bounds = array<i64: 8, 32>}, {transform_indices = @transform_2, window_bounds = array<i64: 8, 32>}, {transform_indices = @transform_3, window_bounds = array<i64: 1, 1, 1>}]} {
    %c0_i32 = arith.constant 0 : i32
    %0 = arith.cmpi eq, %arg1, %c0_i32 : i32
    %1 = arith.extui %0 : i1 to i32
    %c0_i32_0 = arith.constant 0 : i32
    %2 = arith.cmpi ne, %1, %c0_i32_0 : i32
    scf.if %2 {
      %cst_25 = arith.constant 0.000000e+00 : f32
      %63 = vector.broadcast %cst_25 : f32 to vector<1x1x1xf32>
      %c0_26 = arith.constant 0 : index
      %c0_27 = arith.constant 0 : index
      %c0_28 = arith.constant 0 : index
      %64 = vector.load %arg5[%c0_26, %c0_27, %c0_28] : memref<1x1x1xf32, #tpu.memory_space<vmem>>, vector<1x1x1xf32>
      tpu.vector_store %arg5[%c0_26, %c0_27, %c0_28], %63 {strides = array<i32>} : memref<1x1x1xf32, #tpu.memory_space<vmem>>, vector<1x1x1xf32>,
    } else {
    }
    %c0 = arith.constant 0 : index
    %c0_1 = arith.constant 0 : index
    %3 = vector.load %arg2[%c0, %c0_1] : memref<8x32xf32, #tpu.memory_space<vmem>>, vector<8x32xf32>
    %c0_2 = arith.constant 0 : index
    %c0_3 = arith.constant 0 : index
    %4 = vector.load %arg3[%c0_2, %c0_3] : memref<8x32xf32, #tpu.memory_space<vmem>>, vector<8x32xf32>
    %c0_4 = arith.constant 0 : index
    %c0_5 = arith.constant 0 : index
    %5 = vector.load %arg4[%c0_4, %c0_5] : memref<8x32xf32, #tpu.memory_space<vmem>>, vector<8x32xf32>
    %6 = arith.mulf %3, %3 : vector<8x32xf32>
    %cst = arith.constant dense<0.000000e+00> : vector<8xf32>
    %7 = vector.multi_reduction <add>, %6, %cst [1] : vector<8x32xf32> to vector<8xf32>
    %8 = vector.shape_cast %7 : vector<8xf32> to vector<8x1xf32>
    %9 = arith.mulf %4, %4 : vector<8x32xf32>
    %cst_6 = arith.constant dense<0.000000e+00> : vector<8xf32>
    %10 = vector.multi_reduction <add>, %9, %cst_6 [1] : vector<8x32xf32> to vector<8xf32>
    %11 = vector.shape_cast %10 : vector<8xf32> to vector<8x1xf32>
    %12 = arith.mulf %5, %5 : vector<8x32xf32>
    %cst_7 = arith.constant dense<0.000000e+00> : vector<8xf32>
    %13 = vector.multi_reduction <add>, %12, %cst_7 [1] : vector<8x32xf32> to vector<8xf32>
    %14 = vector.shape_cast %13 : vector<8xf32> to vector<8x1xf32>
    %15 = arith.mulf %3, %4 : vector<8x32xf32>
    %cst_8 = arith.constant dense<0.000000e+00> : vector<8xf32>
    %16 = vector.multi_reduction <add>, %15, %cst_8 [1] : vector<8x32xf32> to vector<8xf32>
    %17 = vector.shape_cast %16 : vector<8xf32> to vector<8x1xf32>
    %18 = arith.mulf %3, %5 : vector<8x32xf32>
    %cst_9 = arith.constant dense<0.000000e+00> : vector<8xf32>
    %19 = vector.multi_reduction <add>, %18, %cst_9 [1] : vector<8x32xf32> to vector<8xf32>
    %20 = vector.shape_cast %19 : vector<8xf32> to vector<8x1xf32>
    %cst_10 = arith.constant 1.000000e-24 : f32
    %21 = vector.broadcast %cst_10 : f32 to vector<8x1xf32>
    %22 = arith.maximumf %8, %21 : vector<8x1xf32>
    %23 = math.rsqrt %22 : vector<8x1xf32>
    %cst_11 = arith.constant 1.000000e-24 : f32
    %24 = vector.broadcast %cst_11 : f32 to vector<8x1xf32>
    %25 = arith.maximumf %11, %24 : vector<8x1xf32>
    %26 = math.rsqrt %25 : vector<8x1xf32>
    %cst_12 = arith.constant 1.000000e-24 : f32
    %27 = vector.broadcast %cst_12 : f32 to vector<8x1xf32>
    %28 = arith.maximumf %14, %27 : vector<8x1xf32>
    %29 = math.rsqrt %28 : vector<8x1xf32>
    %30 = arith.mulf %17, %23 : vector<8x1xf32>
    %31 = arith.mulf %30, %26 : vector<8x1xf32>
    %32 = arith.mulf %20, %23 : vector<8x1xf32>
    %33 = arith.mulf %32, %29 : vector<8x1xf32>
    %34 = arith.subf %33, %31 : vector<8x1xf32>
    %cst_13 = arith.constant 2.000000e+00 : f32
    %35 = vector.broadcast %cst_13 : f32 to vector<8x1xf32>
    %36 = arith.mulf %34, %35 : vector<8x1xf32>
    %cst_14 = arith.constant 0.000000e+00 : f32
    %37 = vector.broadcast %cst_14 : f32 to vector<8x1xf32>
    %38 = arith.maximumf %36, %37 : vector<8x1xf32>
    %39 = math.absf %36 : vector<8x1xf32>
    %cst_15 = arith.constant 0.000000e+00 : f32
    %40 = vector.broadcast %cst_15 : f32 to vector<8x1xf32>
    %41 = arith.subf %40, %39 : vector<8x1xf32>
    %42 = math.exp %41 : vector<8x1xf32>
    %43 = math.log1p %42 : vector<8x1xf32>
    %44 = arith.addf %38, %43 : vector<8x1xf32>
    %c1_i32 = arith.constant 1 : i32
    %45 = arith.muli %arg0, %c1_i32 : i32
    %46 = arith.addi %45, %arg1 : i32
    %c8_i32 = arith.constant 8 : i32
    %47 = arith.muli %46, %c8_i32 : i32
    %48 = tpu.iota {dimensions = array<i32: 0>} : vector<8x1xi32>
    %49 = vector.broadcast %47 : i32 to vector<8x1xi32>
    %50 = arith.addi %49, %48 : vector<8x1xi32>
    %c8_i32_16 = arith.constant 8 : i32
    %51 = vector.broadcast %c8_i32_16 : i32 to vector<8x1xi32>
    %52 = arith.cmpi slt, %50, %51 : vector<8x1xi32>
    %cst_17 = arith.constant 0.000000e+00 : f32
    %53 = vector.broadcast %cst_17 : f32 to vector<8x1xf32>
    %54 = arith.select %52, %44, %53 : vector<8x1xi1>, vector<8x1xf32>
    %c0_18 = arith.constant 0 : index
    %c0_19 = arith.constant 0 : index
    %c0_20 = arith.constant 0 : index
    %55 = vector.load %arg5[%c0_18, %c0_19, %c0_20] : memref<1x1x1xf32, #tpu.memory_space<vmem>>, vector<1x1x1xf32>
    %56 = vector.shape_cast %54 : vector<8x1xf32> to vector<1x8x1xf32>
    %cst_21 = arith.constant dense<0.000000e+00> : vector<1xf32>
    %57 = vector.multi_reduction <add>, %56, %cst_21 [1, 2] : vector<1x8x1xf32> to vector<1xf32>
    %58 = vector.shape_cast %57 : vector<1xf32> to vector<1x1x1xf32>
    %59 = vector.extract %58[0, 0, 0] : f32 from vector<1x1x1xf32>
    %60 = vector.broadcast %59 : f32 to vector<1x1x1xf32>
    %61 = arith.addf %55, %60 : vector<1x1x1xf32>
    %c0_22 = arith.constant 0 : index
    %c0_23 = arith.constant 0 : index
    %c0_24 = arith.constant 0 : index
    %62 = vector.load %arg5[%c0_22, %c0_23, %c0_24] : memref<1x1x1xf32, #tpu.memory_space<vmem>>, vector<1x1x1xf32>
    tpu.vector_store %arg5[%c0_22, %c0_23, %c0_24], %61 {strides = array<i32>} : memref<1x1x1xf32, #tpu.memory_space<vmem>>, vector<1x1x1xf32>,
    return
  }
  func.func @transform_0(%arg0: i32, %arg1: i32) -> (i32, i32) {
    %c1_i32 = arith.constant 1 : i32
    %0 = arith.muli %arg0, %c1_i32 : i32
    %1 = arith.addi %0, %arg1 : i32
    %c0_i32 = arith.constant 0 : i32
    %2 = arith.minsi %1, %c0_i32 : i32
    %c0_i32_0 = arith.constant 0 : i32
    %c0_i32_1 = arith.constant 0 : i32
    return %2, %c0_i32_0 : i32, i32
  }
  func.func @transform_1(%arg0: i32, %arg1: i32) -> (i32, i32) {
    %c1_i32 = arith.constant 1 : i32
    %0 = arith.muli %arg0, %c1_i32 : i32
    %1 = arith.addi %0, %arg1 : i32
    %c0_i32 = arith.constant 0 : i32
    %2 = arith.minsi %1, %c0_i32 : i32
    %c0_i32_0 = arith.constant 0 : i32
    %c0_i32_1 = arith.constant 0 : i32
    return %2, %c0_i32_0 : i32, i32
  }
  func.func @transform_2(%arg0: i32, %arg1: i32) -> (i32, i32) {
    %c1_i32 = arith.constant 1 : i32
    %0 = arith.muli %arg0, %c1_i32 : i32
    %1 = arith.addi %0, %arg1 : i32
    %c0_i32 = arith.constant 0 : i32
    %2 = arith.minsi %1, %c0_i32 : i32
    %c0_i32_0 = arith.constant 0 : i32
    %c0_i32_1 = arith.constant 0 : i32
    return %2, %c0_i32_0 : i32, i32
  }
  func.func @transform_3(%arg0: i32, %arg1: i32) -> (i32, i32, i32) {
    %c0_i32 = arith.constant 0 : i32
    %c0_i32_0 = arith.constant 0 : i32
    %c0_i32_1 = arith.constant 0 : i32
    return %arg0, %c0_i32, %c0_i32_0 : i32, i32, i32
  }
}

</mosaic_0001>

<bundles_post_ra>
// kernel: tpu_custom_call.1
= control target key start
LH: loop header
LB: loop body
LE: loop exit
PB: predicated region body
PF: predicated region fallthrough
CT: control target
= control target key end

     0   :  { %8 = vsyncpa [#allocation3], 0  ;;  %s895_s0 = inlined_call_operand.hbm [shape: f32[8,32], index: 0, kind: input, shape index: {}]   ;;  %s896_s1 = inlined_call_operand.hbm [shape: f32[8,32], index: 1, kind: input, shape index: {}]   ;;  %s897_s2 = inlined_call_operand.hbm [shape: f32[8,32], index: 2, kind: input, shape index: {}]   ;;  %s898_s3 = inlined_call_operand.vmem [shape: f32[2,1,1], index: 3, kind: output, shape index: {}]  }
   0x1   :  { %10 = vsyncpa [#allocation3 + $0x1], 0 }
   0x2   :  { %11 = vsyncpa [#allocation5], 0 }
   0x3   :  { %13 = vsyncpa [#allocation5 + $0x1], 0  ;;  %s750_s12 = smov 0   ;;  %s752_s13 = smov 0  }
   0x4   :  { %s754_s14 = smov 0   ;;  %s756_s15 = smov 0  }
   0x5   :  { %s758_s16 = smov 0  }
   0x6 LB: > { %s494_s17 = sadd.s32 4294967295, %s724_s16   ;;  %s31_s18 = sadd.s32 1, %s720_s15  ;;  %s724_s16 = sphi %s758_s16, %s19_s16   ;;  %s720_s15 = sphi %s756_s15, %s909_s15   ;;  %s716_s14 = sphi %s754_s14, %s908_s14   ;;  %s712_s13 = sphi %s752_s13, %s885_s13   ;;  %s708_s12 = sphi %s750_s12, %s907_s12  }
   0x7   : > { %p33_p0 = scmp.ge.s32.totalorder %s31_s18, 2  ;;  %p705_p1 = scmp.ne.s32.totalorder %s712_s13, 0 }
   0x8   : > { %p52_p2 = scmp.eq.s32.totalorder %s724_s16, 0  ;;  %p57_p3 = scmp.ne.s32.totalorder %s712_s13, %s708_s12 }
   0x9   : > { %s911_s18 = smov (%p33_p0, %s31_s18), 0  ;;  %p58_p4 = scmp.eq.s32.totalorder %s494_s17, 0 }
   0xa   : > { %p53_p5 = por %p705_p1, %p52_p2  ;;  %p529_p7 = scmp.lt.s32.totalorder %s724_s16, 2 }
   0xb   : > { %p782_p6 = por %p58_p4, %p57_p3  ;;  %s192_s21 = sand.u32 1, %s724_s16  }
   0xc   : > { %p787_p8 = pnand %p529_p7, %p53_p5  ;;  %s726_s22 = smov [#allocation4]  }
   0xd   : > { %s900_s19 = scalar_select %p782_p6, 1, 0 }
   0xe   : > { %s206_s23 = sshll.u32 %s726_s22, 4  ;;  %s793_s24 = scalar_lea.sflag [#allocation5], %s192_s21  ;;  %s207_s23 = int_to_ptr.vmem [resolvable:$true] %s206_s23 }
   0xf   : > { %s589_s27 = scalar_lea.hbm %s896_s1, 128  ;;  %p803_p11 = pneg %p787_p8 }
  0x10   : > { %p590_p10 = scmp.ne.s32.totalorder %s896_s1, %s589_s27  ;;  %p596_p0 = scmp.lt.s32.totalorder %s589_s27, %s589_s27 }
  0x12   : > { %p592_p12 = pnand %p803_p11, %p590_p10 }
  0x14   : > { %p593_p13 = pneg %p592_p12 }
  0x16   : > { %p598_p1 = pnand %p596_p0, %p593_p13 }
  0x18   : > { %601 = shalt.err (!%p598_p1)
}
  0x19   : > { %s602_s4 = scalar_lea.vmem %s207_s23, 128  ;;  %s609_s5 = scalar_lea.vmem %s207_s23, 256 }
  0x1a   : > { %p603_p2 = scmp.ne.s32.totalorder %s207_s23, %s602_s4  ;;  %p610_p5 = scmp.lt.s32.totalorder %s207_s23, %s207_s23 }
  0x1b   : > { %p611_p7 = scmp.lt.s32.totalorder %s609_s5, %s602_s4 }
  0x1c   : > { %p605_p3 = pnand %p603_p2, %p803_p11 }
  0x1d   : > { %p612_p9 = por %p611_p7, %p610_p5 }
  0x1e   : > { %p606_p4 = pneg %p605_p3 }
  0x20   : > { %p613_p6 = pnand %p612_p9, %p606_p4 }
  0x22   : > { %616 = shalt.err (!%p613_p6)
}
  0x23   : > { %525 = dma.hbm_to_vmem [thread:$0]  (!%p787_p8), %s896_s1, 128, %s207_s23, %s793_s24  }
  0x24   : > { %p232_p10 = scmp.lt.s32.totalorder %s724_s16, 3  ;;  %p903_p12 = scmp.ge.s32.totalorder %s724_s16, 1 }
  0x25   : > { %s727_s9 = smov [#allocation2]   ;;  %s617_s21 = scalar_lea.hbm %s895_s0, 128 }
  0x26   : > { %p820_p13 = pnand %p903_p12, %p232_p10  ;;  %s185_s10 = sshll.u32 %s727_s9, 4  ;;  %s186_s10 = int_to_ptr.vmem [resolvable:$true] %s185_s10 }
  0x27   : > { %p618_p6 = scmp.ne.s32.totalorder %s895_s0, %s617_s21  ;;  %p624_p1 = scmp.lt.s32.totalorder %s617_s21, %s617_s21 }
  0x28   : > { %s904_s8 = scalar_select %p820_p13, 1, 0 }
  0x29   : > { %p620_p9 = pnand %p618_p6, %p803_p11 }
  0x2b   : > { %p621_p0 = pneg %p620_p9 }
  0x2d   : > { %p626_p2 = pnand %p624_p1, %p621_p0 }
  0x2f   : > { %629 = shalt.err (!%p626_p2)
}
  0x30   : > { %s630_s23 = scalar_lea.vmem %s186_s10, 128  ;;  %s637_s26 = scalar_lea.vmem %s186_s10, 256 }
  0x31   : > { %p631_p3 = scmp.ne.s32.totalorder %s186_s10, %s630_s23  ;;  %p638_p7 = scmp.lt.s32.totalorder %s186_s10, %s186_s10 }
  0x32   : > { %p639_p10 = scmp.lt.s32.totalorder %s637_s26, %s630_s23 }
  0x33   : > { %p633_p4 = pnand %p631_p3, %p803_p11 }
  0x34   : > { %p640_p12 = por %p639_p10, %p638_p7 }
  0x35   : > { %p634_p5 = pneg %p633_p4 }
  0x37   : > { %p641_p13 = pnand %p640_p12, %p634_p5 }
  0x39   : > { %644 = shalt.err (!%p641_p13)
}
  0x3a   : > { %522 = dma.hbm_to_vmem [thread:$0]  (!%p787_p8), %s895_s0, 128, %s186_s10, [#allocation3]  }
  0x3b   : > { %s728_s29 = smov [#allocation6]   ;;  %s645_s7 = scalar_lea.hbm %s897_s2, 128 }
  0x3c   : > { %s227_s4 = sshll.u32 %s728_s29, 4  ;;  %p646_p6 = scmp.ne.s32.totalorder %s897_s2, %s645_s7  ;;  %s228_s4 = int_to_ptr.vmem [resolvable:$true] %s227_s4 }
  0x3d   : > { %p652_p0 = scmp.lt.s32.totalorder %s645_s7, %s645_s7 }
  0x3e   : > { %p648_p13 = pnand %p646_p6, %p803_p11 }
  0x40   : > { %p649_p9 = pneg %p648_p13 }
  0x42   : > { %p654_p1 = pnand %p652_p0, %p649_p9 }
  0x44   : > { %657 = shalt.err (!%p654_p1)
}
  0x45   : > { %s658_s12 = scalar_lea.vmem %s228_s4, 128  ;;  %s665_s10 = scalar_lea.vmem %s228_s4, 256 }
  0x46   : > { %p659_p2 = scmp.ne.s32.totalorder %s228_s4, %s658_s12  ;;  %p666_p5 = scmp.lt.s32.totalorder %s228_s4, %s228_s4 }
  0x47   : > { %p667_p7 = scmp.lt.s32.totalorder %s665_s10, %s658_s12 }
  0x48   : > { %p661_p3 = pnand %p659_p2, %p803_p11 }
  0x49   : > { %p668_p10 = por %p667_p7, %p666_p5 }
  0x4a   : > { %p662_p4 = pneg %p661_p3 }
  0x4c   : > { %p669_p12 = pnand %p668_p10, %p662_p4 }
  0x4e   : > { %672 = shalt.err (!%p669_p12)
}
  0x4f   : > { %528 = dma.hbm_to_vmem [thread:$0]  (!%p787_p8), %s897_s2, 128, %s228_s4, %s793_s24  }
  0x50   : > { %p905_p6 = scmp.ne.s32.totalorder %s904_s8, 0 }
  0x51   : > { %s238_s30 = sand.u32 (!%p905_p6), 1, %s712_s13   ;;  %p906_p11 = scmp.ne.s32.totalorder (!%p905_p6), %s900_s19, 0 }
  0x52   : > { %236 = sbr.rel (%p905_p6) target bundleno = 506 (0x1fa), region = 32  ;;  %s505_s25 = sshll.u32 (!%p905_p6), %s238_s30, 3 }
  0x53   : > { %s239_s23 = scalar_lea.sflag (!%p905_p6), [#allocation3], %s238_s30  ;;  %s242_s26 = scalar_lea.vmem (!%p905_p6), [#allocation2], %s505_s25 }
  0x57   : > { %698 = dma.done.wait (%p906_p11), %s239_s23, 128  }
  0x58   : > { %700 = vsyncadd (%p906_p11), %s239_s23, 4294967168  ;;  %s247_s20 = sand.u32 1, %s494_s17   ;;  %s251_s24 = scalar_lea.vmem [#allocation4], %s505_s25 }
  0x59   : > { %s248_s27 = scalar_lea.sflag [#allocation5], %s247_s20 }
  0x5a   : > { %702 = dma.done.wait (%p906_p11), %s248_s27, 256  }
  0x5b   : > { %704 = vsyncadd (%p906_p11), %s248_s27, 4294967040  ;;  %v309_v0 = vld [vmem:[%s242_s26] sm:$0xff]  ;;  %vm313_vm0 = vcmask 261120   ;;  %s260_s8 = scalar_lea.vmem [#allocation6], %s505_s25  ;;  %v310_v2 = vld [vmem:[%s251_s24] sm:$0xff]  ;;  %v362_v35 = vlaneseq  ;;  %s508_s17 = sshll.u32 %s716_s14, 3 }
  0x5c   : > { %v311_v1 = vld [vmem:[%s260_s8] sm:$0xff]  ;;  %v312_v3 = vmul.f32 %v309_v0, %v309_v0  ;;  %v317_v5 = vmul.f32 %v310_v2, %v310_v2  ;;  %v325_v6 = vmul.f32 %v310_v2, %v309_v0  ;;  %v364_v38 = vstv %s508_s17  ;;  %p300_p8 = scmp.lt.s32.totalorder %s716_s14, 1 }
  0x5d   : > { %v321_v4 = vmul.f32 %v311_v1, %v311_v1  ;;  %v329_v11 = vmul.f32 %v311_v1, %v309_v0  ;;  %v363_v37 = vshrl.u32 %v362_v35, 7  ;;  %vm369_vm3 = vcmask 7168  }
  0x5e   : > { %v314_v7 = vsel %vm313_vm0, %v312_v3, 0.0  ;;  %v318_v9 = vsel %vm313_vm0, %v317_v5, 0.0  ;;  %v326_v10 = vsel %vm313_vm0, %v325_v6, 0.0  ;;  %s913_s14 = smov (!%p300_p8, %s716_s14), 1  ;;  %vm307_vm4 = vcmask 0  }
  0x5f   : > { %v322_v8 = vsel %vm313_vm0, %v321_v4, 0.0  ;;  %315 = vadd.xlane.f32.xlu0 %v314_v7  ;;  %v330_v12 = vsel %vm313_vm0, %v329_v11, 0.0  ;;  %v365_v41 = vadd.s32 %v364_v38, %v363_v37  ;;  %s302_s29 = scalar_lea.vmem %s898_s3, %s913_s14  ;;  %v729_v50 = vmov 0.0  }
  0x60   : > { %323 = vadd.xlane.f32.xlu1 %v322_v8  ;;  %308 = vst.msk [vmem:[%s302_s29] sm:$0x1] %vm307_vm4, %v729_v50 }
  0x61   : > { %vm366_vm2 = vcmp.lt.s32.totalorder %v365_v41, 8 }
  0x63   : > { %319 = vadd.xlane.f32.xlu0 %v318_v9 }
  0x64   : > { %327 = vadd.xlane.f32.xlu1 %v326_v10 }
  0x67   : > { %331 = vadd.xlane.f32.xlu0 %v330_v12  ;;  %v368_v58 = vld [vmem:[%s302_s29] sm:$0x1] }
  0xe8   : > { %v316_v13 = vpop.xlane.xlu0 %315 }
  0xe9   : > { %v324_v14 = vpop.xlane.xlu1 %323  ;;  %v333_v15 = vmax.f32 %v316_v13, 1e-24 }
  0xea   : > { %v337_v16 = vmax.f32 %v324_v14, 1e-24 }
  0xeb   : > { %579 = vrsqrt.f32 %v333_v15 }
  0xec   : > { %v320_v17 = vpop.xlane.xlu0 %319  ;;  %581 = vrsqrt.f32 %v337_v16 }
  0xed   : > { %v335_v18 = vmax.f32 %v320_v17, 1e-24  ;;  %v328_v21 = vpop.xlane.xlu1 %327 }
  0xef   : > { %583 = vrsqrt.f32 %v335_v18 }
  0xf0   : > { %v332_v19 = vpop.xlane.xlu0 %331 }
  0xf8   : > { %v580_v20 = vpop.eup %579 }
  0xf9   : > { %v341_v22 = vmul.f32 %v580_v20, %v332_v19  ;;  %v582_v23 = vpop.eup %581  ;;  %v339_v24 = vmul.f32 %v580_v20, %v328_v21 }
  0xfb   : > { %v342_v27 = vmul.f32 %v582_v23, %v341_v22 }
  0xfc   : > { %v584_v25 = vpop.eup %583 }
  0xfd   : > { %v340_v26 = vmul.f32 %v584_v25, %v339_v24 }
  0xff   : > { %v343_v28 = vsub.f32 %v342_v27, %v340_v26 }
 0x101   : > { %v344_v29 = vmul.f32 2.0, %v343_v28 }
 0x103   : > { %v346_v30 = vand.u32 2147483647, %v344_v29  ;;  %v345_v45 = vmax.f32 %v344_v29, 0.0 }
 0x105   : > { %v347_v31 = vsub.f32 0.0, %v346_v30 }
 0x107   : > { %v348_v32 = vmul.f32 1.442695, %v347_v31 }
 0x109   : > { %585 = vpow2.f32 %v348_v32 }
 0x116   : > { %v586_v33 = vpop.eup %585 }
 0x117   : > { %v350_v34 = vadd.f32 1.0, %v586_v33  ;;  %v353_v36 = vmul.f32 -0.5, %v586_v33  ;;  %v356_v40 = vand.u32 2147483647, %v586_v33 }
 0x119   : > { %587 = vlog2.f32 %v350_v34  ;;  %v354_v39 = vadd.f32 1.0, %v353_v36  ;;  %vm357_vm1 = vcmp.lt.f32.partialorder %v356_v40, 0.0004427343 }
 0x11b   : > { %v355_v44 = vmul.f32 %v586_v33, %v354_v39 }
 0x126   : > { %v588_v42 = vpop.eup %587 }
 0x127   : > { %v352_v43 = vmul.f32 0.6931472, %v588_v42 }
 0x129   : > { %v358_v46 = vsel %vm357_vm1, %v355_v44, %v352_v43 }
 0x12a   : > { %v359_v47 = vadd.f32 %v358_v46, %v345_v45 }
 0x12c   : > { %v367_v48 = vsel %vm366_vm2, %v359_v47, 0.0 }
 0x12d   : > { %v370_v49 = vsel %vm369_vm3, %v367_v48, 0.0 }
 0x12e   : > { %371 = vadd.xlane.f32.xlu1 %v370_v49 }
 0x1b7   : > { %v372_v51 = vpop.xlane.xlu1 %371 }
 0x1b8   : > { %v373_v52 = vrot.slane %v372_v51, 4 }
 0x1ba   : > { %v374_v53 = vadd.f32 %v373_v52, %v372_v51 }
 0x1bc   : > { %v375_v54 = vrot.slane %v374_v53, 2 }
 0x1be   : > { %v376_v55 = vadd.f32 %v375_v54, %v374_v53 }
 0x1c0   : > { %v377_v56 = vrot.slane %v376_v55, 1 }
 0x1c2   : > { %v378_v57 = vadd.f32 %v377_v56, %v376_v55 }
 0x1c4   : > { %511 = vpush %v378_v57 }
 0x1f5   : > { %s512_s4 = spop %511 }
 0x1f6   : > { %v380_v59 = vstv %s512_s4 }
 0x1f7   : > { %v381_v60 = vadd.f32 %v380_v59, %v368_v58 }
 0x1f9   : > { %383 = vst.msk [vmem:[%s302_s29] sm:$0x1] %vm307_vm4, %v381_v60 }
 0x1fa PF: > { %s19_s16 = sadd.s32 1, %s724_s16   ;;  %s907_s12 = smov %s712_s13 }
 0x1fb   : > { %p16_p13 = scmp.ge.s32.totalorder %s19_s16, 4   ;;  %s885_s13 = smov 0  }
 0x1fc   : > { %s908_s14 = smov %s720_s15  ;;  %s909_s15 = smov %s911_s18 }
 0x1fd   :  { %18 = sbr.rel (!%p16_p13) target bundleno = 6 (0x6), region = 100 }
 0x202   :  { %401 = vsyncpa [#allocation3], 1 }
 0x203   :  { %403 = vsyncpa [#allocation3 + $0x1], 1 }
 0x204   :  { %404 = vsyncpa [#allocation5], 1 }
 0x205   :  { %406 = vsyncpa [#allocation5 + $0x1], 1 }

</bundles_post_ra>
